<compile_context>
chip_gen: v7x
topology: tpu7x:2x2x1
jax: 0.10.0
libtpu: 0.0.40
codegen_flags: <defaults>
</compile_context>

<pallas_src>
import jax
import jax.numpy as jnp
from jax.experimental import pallas as pl
from jax.experimental.pallas import tpu as pltpu

IN_FEATURES = 32
HIDDEN = [512, 256, 128]
OUT_FEATURES = 2
W4_PAD = 128       # final matmul kept N=128 (lane-dense MXU result / no sub-128-N matmul)
OUT_STORE = 8      # narrow HBM writeback width (== full last dim of the output array)
BN_EPS = 1e-5
NORM_EPS = 1e-6


def _round_up(n, m):
    return ((n + m - 1) // m) * m


def _cdiv(a, b):
    return -(-a // b)


def _mlp_circle_kernel(x_ref,
                       w1_ref, b1_ref,
                       w2_ref, b2_ref,
                       w3_ref, b3_ref,
                       w4_ref, b4_ref,
                       out_ref):
    """Whole MLP + unit-circle normalization for one batch tile."""
    cd = w1_ref.dtype                                   # compute dtype for MXU inputs (bf16)

    h = x_ref[...].astype(cd)                                              # (TB, 32)

    # hidden layer 1: Linear (BN scale pre-folded) + shift + ReLU
    h = jnp.dot(h, w1_ref[...], preferred_element_type=jnp.float32)
    h = jnp.maximum(h + b1_ref[...], 0.0).astype(cd)                       # (TB, 512)

    # hidden layer 2
    h = jnp.dot(h, w2_ref[...], preferred_element_type=jnp.float32)
    h = jnp.maximum(h + b2_ref[...], 0.0).astype(cd)                       # (TB, 256)

    # hidden layer 3
    h = jnp.dot(h, w3_ref[...], preferred_element_type=jnp.float32)
    h = jnp.maximum(h + b3_ref[...], 0.0).astype(cd)                       # (TB, 128)

    # output layer: lane-dense N=128 matmul (columns >= 2 are exact zeros by construction)
    phi = jnp.dot(h, w4_ref[...], preferred_element_type=jnp.float32)
    phi = phi + b4_ref[...]                                                # (TB, 128)

    # keep only the narrow slab that is actually written back (cols 2..7 are zero,
    # so the reduction below equals the 2-element L2 norm)
    phi8 = phi[:, :OUT_STORE]                                              # (TB, 8)

    # project onto unit circle: phi / (||phi||_2 + 1e-6)
    ss = jnp.sum(phi8 * phi8, axis=-1, keepdims=True)                      # (TB, 1)
    inv = pl.reciprocal(jnp.sqrt(ss) + NORM_EPS, approx=False)
    out_ref[...] = (phi8 * inv).astype(out_ref.dtype)                      # 16x less writeback


def _rep_spec(arr):
    """Parameter block replicated across the batch grid (fetched once, constant index)."""
    shape = arr.shape
    return pl.BlockSpec(shape, lambda i: (0,) * len(shape))


def in_membrane_circle_regressor(x, params, *, tile_b=2048,
                                 vmem_limit_bytes=32 * 1024 * 1024):
    """x: (B, IN_FEATURES) f32 (or bf16) -> (B, 2) f32 unit vectors."""
    B, F = x.shape
    assert F == IN_FEATURES
    (w1, b1), (w2, b2), (w3, b3), (w4, b4) = params

    # Tile sizing:
    #  * big default tile (2048) amortizes per-grid-step overhead,
    #  * cap at ceil(B/2) (sublane-aligned) so grid_b >= 2 whenever possible -> the
    #    "parallel" batch axis can shard across both v7x TensorCores,
    #  * never below the 8-row sublane alignment.
    half_b = _round_up(max(_cdiv(B, 2), 8), 8)
    tb = max(8, min(_round_up(tile_b, 8), half_b))
    grid_b = _cdiv(B, tb)
    b_pad = grid_b * tb
    if b_pad != B:
        x = jnp.pad(x, ((0, b_pad - B), (0, 0)))       # zero rows -> finite output, sliced off

    flat = (w1, b1, w2, b2, w3, b3, w4, b4)
    in_specs = [pl.BlockSpec((tb, F), lambda i: (i, 0))] + [_rep_spec(a) for a in flat]

    out = pl.pallas_call(
        _mlp_circle_kernel,
        out_shape=jax.ShapeDtypeStruct((b_pad, OUT_STORE), jnp.float32),
        grid_spec=pltpu.PrefetchScalarGridSpec(
            num_scalar_prefetch=0,
            grid=(grid_b,),
            in_specs=in_specs,
            out_specs=pl.BlockSpec((tb, OUT_STORE), lambda i: (i, 0)),
        ),
        compiler_params=pltpu.CompilerParams(
            dimension_semantics=("parallel",),
            vmem_limit_bytes=vmem_limit_bytes,
        ),
    )(x, *flat)

    return out[:B, :OUT_FEATURES]


def init_params(key, *, compute_dtype=jnp.bfloat16):
    """Deterministic synthetic init mimicking the module's _init_weights:
       kaiming_normal (fan_in, relu) for Linear weights; zero Linear biases;
       BatchNorm1d at default init (gamma=1, beta=0, running_mean=0, running_var=1).
       The BN scale is folded into the weight columns; only the shift remains."""
    dims = [IN_FEATURES] + HIDDEN + [OUT_FEATURES]
    keys = jax.random.split(key, len(dims) - 1)
    params = []
    for li, (fin, fout) in enumerate(zip(dims[:-1], dims[1:])):
        std = (2.0 / fin) ** 0.5  # kaiming_normal_, mode='fan_in', nonlinearity='relu'
        w = std * jax.random.normal(keys[li], (fin, fout), dtype=jnp.float32)  # pre-transposed
        bias = jnp.zeros((fout,), jnp.float32)
        if li < len(HIDDEN):
            gamma = jnp.ones((fout,), jnp.float32)
            beta = jnp.zeros((fout,), jnp.float32)
            run_mean = jnp.zeros((fout,), jnp.float32)
            run_var = jnp.ones((fout,), jnp.float32)
            s = gamma / jnp.sqrt(run_var + BN_EPS)
            w = w * s[None, :]                       # fold BN scale into the weight columns
            shift = (bias - run_mean) * s + beta     # remaining additive per-feature shift
        else:
            # pad final layer to W4_PAD lanes with exact zeros (lane-dense N=128 matmul;
            # the kernel only stores the first OUT_STORE columns)
            w = jnp.pad(w, ((0, 0), (0, W4_PAD - fout)))
            shift = jnp.pad(bias, (0, W4_PAD - fout))
        params.append((w.astype(compute_dtype), shift[None, :].astype(jnp.float32)))
    return tuple(params)


def reference_forward(x, params):
    """Pure-JAX reference using the same prepared params / dtype path as the kernel."""
    (w1, b1), (w2, b2), (w3, b3), (w4, b4) = params
    cd = w1.dtype
    h = x.astype(cd)
    h = jnp.maximum(jnp.dot(h, w1, preferred_element_type=jnp.float32) + b1, 0.0).astype(cd)
    h = jnp.maximum(jnp.dot(h, w2, preferred_element_type=jnp.float32) + b2, 0.0).astype(cd)
    h = jnp.maximum(jnp.dot(h, w3, preferred_element_type=jnp.float32) + b3, 0.0).astype(cd)
    phi = jnp.dot(h, w4, preferred_element_type=jnp.float32) + b4
    phi = phi[:, :OUT_FEATURES]
    norm = jnp.sqrt(jnp.sum(phi * phi, axis=-1, keepdims=True))
    return phi / (norm + NORM_EPS)


if __name__ == "__main__":
    key = jax.random.PRNGKey(0)
    kx, kp = jax.random.split(key)

    params = init_params(kp)

    # small batch (single grid step; tile capped to the aligned batch size)
    B = 8
    x = jax.random.normal(kx, (B, IN_FEATURES), dtype=jnp.float32)
    out = jax.block_until_ready(in_membrane_circle_regressor(x, params))
    ref = reference_forward(x, params)
    assert out.shape == (B, OUT_FEATURES)
    assert jnp.allclose(out, ref, atol=1e-3, rtol=1e-3), "mismatch vs JAX reference (B=8)"
    assert jnp.allclose(jnp.linalg.norm(out, axis=-1), 1.0, atol=1e-3)

    # ragged batch, multi-step grid (exercises cdiv + padding + the >=2-step parallel axis)
    B2 = 300
    x2 = jax.random.normal(jax.random.PRNGKey(1), (B2, IN_FEATURES), dtype=jnp.float32)
    out2 = jax.block_until_ready(in_membrane_circle_regressor(x2, params))
    ref2 = reference_forward(x2, params)
    assert out2.shape == (B2, OUT_FEATURES)
    assert jnp.allclose(out2, ref2, atol=1e-3, rtol=1e-3), "mismatch vs JAX reference (B=300)"
    assert jnp.allclose(jnp.linalg.norm(out2, axis=-1), 1.0, atol=1e-3)

    print("KERNEL_OK")
</pallas_src>

<mosaic_0001>
module attributes {stable_mosaic.version = 11 : i64} {
  func.func @_mlp_circle_kernel(%arg0: i32, %arg1: memref<8x32xf32, #tpu.memory_space<vmem>>, %arg2: memref<32x512xbf16, #tpu.memory_space<vmem>>, %arg3: memref<1x512xf32, #tpu.memory_space<vmem>>, %arg4: memref<512x256xbf16, #tpu.memory_space<vmem>>, %arg5: memref<1x256xf32, #tpu.memory_space<vmem>>, %arg6: memref<256x128xbf16, #tpu.memory_space<vmem>>, %arg7: memref<1x128xf32, #tpu.memory_space<vmem>>, %arg8: memref<128x128xbf16, #tpu.memory_space<vmem>>, %arg9: memref<1x128xf32, #tpu.memory_space<vmem>>, %arg10: memref<8x8xf32, #tpu.memory_space<vmem>>) attributes {dimension_semantics = [#tpu.dimension_semantics<parallel>], iteration_bounds = array<i64: 1>, scalar_prefetch = 0 : i64, scratch_operands = 0 : i64, tpu.core_type = #tpu.core_type<tc>, window_params = [{transform_indices = @transform_0, window_bounds = array<i64: 8, 32>}, {pipeline_mode = #tpu.pipeline_mode<synchronous>, transform_indices = @transform_1, window_bounds = array<i64: 32, 512>}, {pipeline_mode = #tpu.pipeline_mode<synchronous>, transform_indices = @transform_2, window_bounds = array<i64: 1, 512>}, {pipeline_mode = #tpu.pipeline_mode<synchronous>, transform_indices = @transform_3, window_bounds = array<i64: 512, 256>}, {pipeline_mode = #tpu.pipeline_mode<synchronous>, transform_indices = @transform_4, window_bounds = array<i64: 1, 256>}, {pipeline_mode = #tpu.pipeline_mode<synchronous>, transform_indices = @transform_5, window_bounds = array<i64: 256, 128>}, {pipeline_mode = #tpu.pipeline_mode<synchronous>, transform_indices = @transform_6, window_bounds = array<i64: 1, 128>}, {pipeline_mode = #tpu.pipeline_mode<synchronous>, transform_indices = @transform_7, window_bounds = array<i64: 128, 128>}, {pipeline_mode = #tpu.pipeline_mode<synchronous>, transform_indices = @transform_8, window_bounds = array<i64: 1, 128>}, {transform_indices = @transform_9, window_bounds = array<i64: 8, 8>}]} {
    %c0 = arith.constant 0 : index
    %c0_0 = arith.constant 0 : index
    %0 = vector.load %arg1[%c0, %c0_0] : memref<8x32xf32, #tpu.memory_space<vmem>>, vector<8x32xf32>
    %1 = arith.truncf %0 : vector<8x32xf32> to vector<8x32xbf16>
    %c0_1 = arith.constant 0 : index
    %c0_2 = arith.constant 0 : index
    %2 = vector.load %arg2[%c0_1, %c0_2] : memref<32x512xbf16, #tpu.memory_space<vmem>>, vector<32x512xbf16>
    %cst = arith.constant dense<0.000000e+00> : vector<8x512xf32>
    %3 = tpu.matmul %1, %2, %cst {dimension_numbers = #tpu.dot_dimension_numbers<[1], [0], [0], [1], [0, 0, 1, 1], [], []>} : vector<8x32xbf16>, vector<32x512xbf16>, vector<8x512xf32> -> vector<8x512xf32>
    %c0_3 = arith.constant 0 : index
    %c0_4 = arith.constant 0 : index
    %4 = vector.load %arg3[%c0_3, %c0_4] : memref<1x512xf32, #tpu.memory_space<vmem>>, vector<1x512xf32>
    %5 = vector.broadcast %4 : vector<1x512xf32> to vector<8x512xf32>
    %6 = arith.addf %3, %5 : vector<8x512xf32>
    %cst_5 = arith.constant 0.000000e+00 : f32
    %7 = vector.broadcast %cst_5 : f32 to vector<8x512xf32>
    %8 = arith.maximumf %6, %7 : vector<8x512xf32>
    %9 = arith.truncf %8 : vector<8x512xf32> to vector<8x512xbf16>
    %c0_6 = arith.constant 0 : index
    %c0_7 = arith.constant 0 : index
    %10 = vector.load %arg4[%c0_6, %c0_7] : memref<512x256xbf16, #tpu.memory_space<vmem>>, vector<512x256xbf16>
    %cst_8 = arith.constant dense<0.000000e+00> : vector<8x256xf32>
    %11 = tpu.matmul %9, %10, %cst_8 {dimension_numbers = #tpu.dot_dimension_numbers<[1], [0], [0], [1], [0, 0, 1, 1], [], []>} : vector<8x512xbf16>, vector<512x256xbf16>, vector<8x256xf32> -> vector<8x256xf32>
    %c0_9 = arith.constant 0 : index
    %c0_10 = arith.constant 0 : index
    %12 = vector.load %arg5[%c0_9, %c0_10] : memref<1x256xf32, #tpu.memory_space<vmem>>, vector<1x256xf32>
    %13 = vector.broadcast %12 : vector<1x256xf32> to vector<8x256xf32>
    %14 = arith.addf %11, %13 : vector<8x256xf32>
    %cst_11 = arith.constant 0.000000e+00 : f32
    %15 = vector.broadcast %cst_11 : f32 to vector<8x256xf32>
    %16 = arith.maximumf %14, %15 : vector<8x256xf32>
    %17 = arith.truncf %16 : vector<8x256xf32> to vector<8x256xbf16>
    %c0_12 = arith.constant 0 : index
    %c0_13 = arith.constant 0 : index
    %18 = vector.load %arg6[%c0_12, %c0_13] : memref<256x128xbf16, #tpu.memory_space<vmem>>, vector<256x128xbf16>
    %cst_14 = arith.constant dense<0.000000e+00> : vector<8x128xf32>
    %19 = tpu.matmul %17, %18, %cst_14 {dimension_numbers = #tpu.dot_dimension_numbers<[1], [0], [0], [1], [0, 0, 1, 1], [], []>} : vector<8x256xbf16>, vector<256x128xbf16>, vector<8x128xf32> -> vector<8x128xf32>
    %c0_15 = arith.constant 0 : index
    %c0_16 = arith.constant 0 : index
    %20 = vector.load %arg7[%c0_15, %c0_16] : memref<1x128xf32, #tpu.memory_space<vmem>>, vector<1x128xf32>
    %21 = vector.broadcast %20 : vector<1x128xf32> to vector<8x128xf32>
    %22 = arith.addf %19, %21 : vector<8x128xf32>
    %cst_17 = arith.constant 0.000000e+00 : f32
    %23 = vector.broadcast %cst_17 : f32 to vector<8x128xf32>
    %24 = arith.maximumf %22, %23 : vector<8x128xf32>
    %25 = arith.truncf %24 : vector<8x128xf32> to vector<8x128xbf16>
    %c0_18 = arith.constant 0 : index
    %c0_19 = arith.constant 0 : index
    %26 = vector.load %arg8[%c0_18, %c0_19] : memref<128x128xbf16, #tpu.memory_space<vmem>>, vector<128x128xbf16>
    %cst_20 = arith.constant dense<0.000000e+00> : vector<8x128xf32>
    %27 = tpu.matmul %25, %26, %cst_20 {dimension_numbers = #tpu.dot_dimension_numbers<[1], [0], [0], [1], [0, 0, 1, 1], [], []>} : vector<8x128xbf16>, vector<128x128xbf16>, vector<8x128xf32> -> vector<8x128xf32>
    %c0_21 = arith.constant 0 : index
    %c0_22 = arith.constant 0 : index
    %28 = vector.load %arg9[%c0_21, %c0_22] : memref<1x128xf32, #tpu.memory_space<vmem>>, vector<1x128xf32>
    %29 = vector.broadcast %28 : vector<1x128xf32> to vector<8x128xf32>
    %30 = arith.addf %27, %29 : vector<8x128xf32>
    %31 = vector.extract_strided_slice %30 {offsets = [0, 0], sizes = [8, 8], strides = [1, 1]} : vector<8x128xf32> to vector<8x8xf32>
    %32 = arith.mulf %31, %31 : vector<8x8xf32>
    %cst_23 = arith.constant dense<0.000000e+00> : vector<8xf32>
    %33 = vector.multi_reduction <add>, %32, %cst_23 [1] : vector<8x8xf32> to vector<8xf32>
    %34 = vector.shape_cast %33 : vector<8xf32> to vector<8x1xf32>
    %35 = math.sqrt %34 : vector<8x1xf32>
    %cst_24 = arith.constant 9.99999997E-7 : f32
    %36 = vector.broadcast %cst_24 : f32 to vector<8x1xf32>
    %37 = arith.addf %35, %36 : vector<8x1xf32>
    %38 = tpu.reciprocal %37 : vector<8x1xf32> -> vector<8x1xf32>
    %39 = vector.broadcast %38 : vector<8x1xf32> to vector<8x8xf32>
    %40 = arith.mulf %31, %39 : vector<8x8xf32>
    %c0_25 = arith.constant 0 : index
    %c0_26 = arith.constant 0 : index
    %41 = vector.load %arg10[%c0_25, %c0_26] : memref<8x8xf32, #tpu.memory_space<vmem>>, vector<8x8xf32>
    tpu.vector_store %arg10[%c0_25, %c0_26], %40 {strides = array<i32>} : memref<8x8xf32, #tpu.memory_space<vmem>>, vector<8x8xf32>,
    return
  }
  func.func @transform_0(%arg0: i32) -> (i32, i32) {
    %c0_i32 = arith.constant 0 : i32
    %c0_i32_0 = arith.constant 0 : i32
    return %arg0, %c0_i32 : i32, i32
  }
  func.func @transform_1(%arg0: i32) -> (i32, i32) {
    %c0_i32 = arith.constant 0 : i32
    %c0_i32_0 = arith.constant 0 : i32
    %c0_i32_1 = arith.constant 0 : i32
    return %c0_i32, %c0_i32_0 : i32, i32
  }
  func.func @transform_2(%arg0: i32) -> (i32, i32) {
    %c0_i32 = arith.constant 0 : i32
    %c0_i32_0 = arith.constant 0 : i32
    %c0_i32_1 = arith.constant 0 : i32
    return %c0_i32, %c0_i32_0 : i32, i32
  }
  func.func @transform_3(%arg0: i32) -> (i32, i32) {
    %c0_i32 = arith.constant 0 : i32
    %c0_i32_0 = arith.constant 0 : i32
    %c0_i32_1 = arith.constant 0 : i32
    return %c0_i32, %c0_i32_0 : i32, i32
  }
  func.func @transform_4(%arg0: i32) -> (i32, i32) {
    %c0_i32 = arith.constant 0 : i32
    %c0_i32_0 = arith.constant 0 : i32
    %c0_i32_1 = arith.constant 0 : i32
    return %c0_i32, %c0_i32_0 : i32, i32
  }
  func.func @transform_5(%arg0: i32) -> (i32, i32) {
    %c0_i32 = arith.constant 0 : i32
    %c0_i32_0 = arith.constant 0 : i32
    %c0_i32_1 = arith.constant 0 : i32
    return %c0_i32, %c0_i32_0 : i32, i32
  }
  func.func @transform_6(%arg0: i32) -> (i32, i32) {
    %c0_i32 = arith.constant 0 : i32
    %c0_i32_0 = arith.constant 0 : i32
    %c0_i32_1 = arith.constant 0 : i32
    return %c0_i32, %c0_i32_0 : i32, i32
  }
  func.func @transform_7(%arg0: i32) -> (i32, i32) {
    %c0_i32 = arith.constant 0 : i32
    %c0_i32_0 = arith.constant 0 : i32
    %c0_i32_1 = arith.constant 0 : i32
    return %c0_i32, %c0_i32_0 : i32, i32
  }
  func.func @transform_8(%arg0: i32) -> (i32, i32) {
    %c0_i32 = arith.constant 0 : i32
    %c0_i32_0 = arith.constant 0 : i32
    %c0_i32_1 = arith.constant 0 : i32
    return %c0_i32, %c0_i32_0 : i32, i32
  }
  func.func @transform_9(%arg0: i32) -> (i32, i32) {
    %c0_i32 = arith.constant 0 : i32
    %c0_i32_0 = arith.constant 0 : i32
    return %arg0, %c0_i32 : i32, i32
  }
}

</mosaic_0001>

<bundles_post_ra>
// kernel: tpu_custom_call.1
= control target key start
LH: loop header
LB: loop body
LE: loop exit
PB: predicated region body
PF: predicated region fallthrough
CT: control target
= control target key end

     0   :  { %14 = vsyncpa [#allocation3], 0  ;;  %s1706_s0 = inlined_call_operand.hbm [shape: f32[8,32], index: 0, kind: input, shape index: {}]   ;;  %s1707_s1 = inlined_call_operand.hbm [shape: bf16[32,512], index: 1, kind: input, shape index: {}]   ;;  %s1708_s2 = inlined_call_operand.vmem [shape: f32[1,512], index: 2, kind: input, shape index: {}]   ;;  %s1709_s3 = inlined_call_operand.hbm [shape: bf16[512,256], index: 3, kind: input, shape index: {}]   ;;  %s1710_s4 = inlined_call_operand.vmem [shape: f32[1,256], index: 4, kind: input, shape index: {}]   ;;  %s1711_s5 = inlined_call_operand.hbm [shape: bf16[256,128], index: 5, kind: input, shape index: {}]   ;;  %s1712_s6 = inlined_call_operand.vmem [shape: f32[1,128], index: 6, kind: input, shape index: {}]   ;;  %s1713_s7 = inlined_call_operand.hbm [shape: bf16[128,128], index: 7, kind: input, shape index: {}]   ;;  %s1714_s8 = inlined_call_operand.vmem [shape: f32[1,128], index: 8, kind: input, shape index: {}]   ;;  %s1715_s9 = inlined_call_operand.hbm [shape: f32[8,8], index: 9, kind: output, shape index: {}]  }
   0x1   :  { %15 = vsyncpa [#allocation6], 0 }
   0x2   :  { %16 = vsyncpa [#allocation9], 0 }
   0x3   :  { %17 = vsyncpa [#allocation4], 0  ;;  %s1517_s30 = smov [#allocation5]   ;;  %s1377_s13 = scalar_lea.hbm %s1707_s1, 1024 }
   0x4   :  { %s33_s10 = sshll.u32 %s1517_s30, 4  ;;  %p1378_p0 = scmp.ne.s32.totalorder %s1707_s1, %s1377_s13  ;;  %s34_s10 = int_to_ptr.vmem [resolvable:$true] %s33_s10 }
   0x5   :  { %p1381_p1 = scmp.lt.u32.totalorder %s1377_s13, %s1707_s1 }
   0x7   :  { %p1383_p2 = pnand %p1381_p1, %p1378_p0 }
   0x9   :  { %1386 = shalt.err (!%p1383_p2)
}
   0xa   :  { %s1387_s18 = scalar_lea.vmem %s34_s10, 1024  ;;  %p1392_p4 = scmp.lt.s32.totalorder %s34_s10, %s34_s10 }
   0xb   :  { %p1388_p3 = scmp.ne.s32.totalorder %s34_s10, %s1387_s18  ;;  %p1393_p5 = scmp.lt.s32.totalorder %s1387_s18, %s1387_s18 }
   0xd   :  { %p1394_p6 = por %p1393_p5, %p1392_p4 }
   0xf   :  { %p1395_p7 = pnand %p1394_p6, %p1388_p3 }
  0x11   :  { %1398 = shalt.err (!%p1395_p7)
}
  0x12   :  { %s1518_s19 = smov 256   ;;  %s1519_s20 = smov 16  }
  0x13   :  { %39 = dma.hbm_to_vmem [thread:$0]  %s1707_s1, 1024, %s34_s10, [#allocation6], %s1518_s19, %s1518_s19, %s1519_s20  }
  0x14   :  { %s1520_s23 = smov [#allocation8]   ;;  %s1399_s27 = scalar_lea.hbm %s1711_s5, 2048 }
  0x15   :  { %s61_s24 = sshll.u32 %s1520_s23, 4  ;;  %p1400_p8 = scmp.ne.s32.totalorder %s1711_s5, %s1399_s27  ;;  %s62_s24 = int_to_ptr.vmem [resolvable:$true] %s61_s24 }
  0x16   :  { %p1403_p9 = scmp.lt.u32.totalorder %s1399_s27, %s1711_s5 }
  0x18   :  { %p1405_p10 = pnand %p1403_p9, %p1400_p8 }
  0x1a   :  { %1408 = shalt.err (!%p1405_p10)
}
  0x1b   :  { %s1409_s12 = scalar_lea.vmem %s62_s24, 2048  ;;  %p1414_p12 = scmp.lt.s32.totalorder %s62_s24, %s62_s24 }
  0x1c   :  { %p1410_p11 = scmp.ne.s32.totalorder %s62_s24, %s1409_s12  ;;  %p1415_p13 = scmp.lt.s32.totalorder %s1409_s12, %s1409_s12 }
  0x1e   :  { %p1416_p0 = por %p1415_p13, %p1414_p12 }
  0x20   :  { %p1417_p1 = pnand %p1416_p0, %p1410_p11 }
  0x22   :  { %1420 = shalt.err (!%p1417_p1)
}
  0x23   :  { %s1521_s1 = smov 64   ;;  %s1522_s10 = smov 4  }
  0x24   :  { %67 = dma.hbm_to_vmem [thread:$0]  %s1711_s5, 2048, %s62_s24, [#allocation9], %s1521_s1, %s1521_s1, %s1522_s10  }
  0x25   :  { %s1523_s15 = smov [#allocation2]   ;;  %s1524_s17 = smov [#allocation7]  }
  0x26   :  { %s24_s16 = sshll.u32 %s1523_s15, 4  ;;  %s47_s18 = sshll.u32 %s1524_s17, 4  ;;  %s25_s16 = int_to_ptr.vmem [resolvable:$true] %s24_s16  ;;  %s1609_s18 = int_to_ptr.vmem [resolvable:$true] %s47_s18 }
  0x27   :  { %s1421_s21 = scalar_lea.hbm %s1706_s0, 128 }
  0x28   :  { %p1422_p2 = scmp.ne.s32.totalorder %s1706_s0, %s1421_s21  ;;  %p1425_p3 = scmp.lt.u32.totalorder %s1421_s21, %s1706_s0 }
  0x2a   :  { %p1427_p4 = pnand %p1425_p3, %p1422_p2 }
  0x2c   :  { %1430 = shalt.err (!%p1427_p4)
}
  0x2d   :  { %s1431_s5 = scalar_lea.vmem %s25_s16, 128  ;;  %p1436_p6 = scmp.lt.s32.totalorder %s25_s16, %s25_s16 }
  0x2e   :  { %p1432_p5 = scmp.ne.s32.totalorder %s25_s16, %s1431_s5  ;;  %p1437_p7 = scmp.lt.s32.totalorder %s1431_s5, %s1431_s5 }
  0x30   :  { %p1438_p8 = por %p1437_p7, %p1436_p6 }
  0x32   :  { %p1439_p9 = pnand %p1438_p8, %p1432_p5 }
  0x34   :  { %1442 = shalt.err (!%p1439_p9)
}
  0x35   :  { %27 = dma.hbm_to_vmem [thread:$0]  %s1706_s0, 128, %s25_s16, [#allocation3]  }
  0x36   :  { %s1443_s30 = scalar_lea.hbm %s1709_s3, 8192 }
  0x37   :  { %p1444_p10 = scmp.ne.s32.totalorder %s1709_s3, %s1443_s30  ;;  %p1447_p11 = scmp.lt.u32.totalorder %s1443_s30, %s1709_s3 }
  0x39   :  { %p1449_p12 = pnand %p1447_p11, %p1444_p10 }
  0x3b   :  { %1452 = shalt.err (!%p1449_p12)
}
  0x3c   :  { %s1453_s15 = scalar_lea.vmem %s1609_s18, 8192  ;;  %p1458_p0 = scmp.lt.s32.totalorder %s1609_s18, %s1609_s18 }
  0x3d   :  { %p1454_p13 = scmp.ne.s32.totalorder %s1609_s18, %s1453_s15  ;;  %p1459_p1 = scmp.lt.s32.totalorder %s1453_s15, %s1453_s15 }
  0x3f   :  { %p1460_p2 = por %p1459_p1, %p1458_p0 }
  0x41   :  { %p1461_p3 = pnand %p1460_p2, %p1454_p13 }
  0x43   :  { %1464 = shalt.err (!%p1461_p3)
}
  0x44   :  { %s1525_s0 = smov 128   ;;  %s1526_s16 = smov 8  }
  0x45   :  { %53 = dma.hbm_to_vmem [thread:$0]  %s1709_s3, 8192, %s1609_s18, [#allocation6], %s1525_s0, %s1525_s0, %s1526_s16  }
  0x46   :  { %s1527_s20 = smov [#allocation10]   ;;  %s1465_s25 = scalar_lea.hbm %s1713_s7, 1024 }
  0x47   :  { %s75_s21 = sshll.u32 %s1527_s20, 4  ;;  %p1466_p4 = scmp.ne.s32.totalorder %s1713_s7, %s1465_s25  ;;  %s76_s21 = int_to_ptr.vmem [resolvable:$true] %s75_s21 }
  0x48   :  { %p1469_p5 = scmp.lt.u32.totalorder %s1465_s25, %s1713_s7 }
  0x4a   :  { %p1471_p6 = pnand %p1469_p5, %p1466_p4 }
  0x4c   :  { %1474 = shalt.err (!%p1471_p6)
}
  0x4d   :  { %s1475_s28 = scalar_lea.vmem %s76_s21, 1024  ;;  %p1480_p8 = scmp.lt.s32.totalorder %s76_s21, %s76_s21 }
  0x4e   :  { %p1476_p7 = scmp.ne.s32.totalorder %s76_s21, %s1475_s28  ;;  %p1481_p9 = scmp.lt.s32.totalorder %s1475_s28, %s1475_s28 }
  0x50   :  { %p1482_p10 = por %p1481_p9, %p1480_p8 }
  0x52   :  { %p1483_p11 = pnand %p1482_p10, %p1476_p7 }
  0x54   :  { %1486 = shalt.err (!%p1483_p11)
}
  0x55   :  { %81 = dma.hbm_to_vmem [thread:$0]  %s1713_s7, 1024, %s76_s21, [#allocation9], %s1521_s1, %s1521_s1, %s1522_s10  }
  0x56   :  { %1509 = dma.done.wait [#allocation3], 128  }
  0x57   :  { %1510 = vsyncadd [#allocation3], 4294967168 }
  0x58   :  { %1511 = dma.done.wait [#allocation6], 9216  }
  0x59   :  { %1512 = vsyncadd [#allocation6], 4294958080 }
  0x5a   :  { %1513 = dma.done.wait [#allocation9], 3072  }
  0x5b   :  { %1514 = vsyncadd [#allocation9], 4294964224  ;;  %v1528_v0 = vmov 0   ;;  %v1241_v1 = vld [vmem:[#allocation5 + $0x4] ss:$16 sps:$4 sm:$0xff]   ;;  %v100_v5 = vld [vmem:[#allocation2] sm:$0xff]  ;;  %v112_v56 = vlaneseq }
  0x5c   :  { %208 = vmatprep.mubr.bf16.mxu1 %v1528_v0  ;;  %v1243_v2 = vld [vmem:[#allocation5] ss:$16 sps:$4 sm:$0xff]   ;;  %176 = vmatprep.subr.bf16.mxu1 %v1241_v1  ;;  %v1244_v3 = vld [vmem:[#allocation5 + $0x24] ss:$16 sps:$4 sm:$0xff]   ;;  %v1249_v6 = vld [vmem:[#allocation5 + $0xc] ss:$16 sps:$4 sm:$0xff]   ;;  %v101_v8 = vpack.c.bf16 %v100_v5, %v100_v5 }
  0x5d   :  { %v1246_v4 = vld [vmem:[#allocation5 + $0x20] ss:$16 sps:$4 sm:$0xff]   ;;  %177 = vmatpush1.bf16.msra.mxu1 %v1243_v2  ;;  %v1247_v7 = vld [vmem:[#allocation5 + $0x8] ss:$16 sps:$4 sm:$0xff]   ;;  %v1253_v9 = vld [vmem:[#allocation7 + $0x4] ss:$8 sps:$4 sm:$0xff]  }
  0x5e   :  { %178 = vmatprep.subr.bf16.mxu1 %v1244_v3  ;;  %v1255_v10 = vld [vmem:[#allocation7] ss:$8 sps:$4 sm:$0xff]   ;;  %vm172_vm0 = vcmask 261120   ;;  %v1256_v11 = vld [vmem:[#allocation7 + $0x14] ss:$8 sps:$4 sm:$0xff]   ;;  %662 = vmatprep.subr.bf16.mxu0 %v1253_v9  ;;  %v1657_v57 = vshrl.u32 %v112_v56, 7 }
  0x5f   :  { %v1252_v12 = vld [vmem:[#allocation5 + $0x2c] ss:$16 sps:$4 sm:$0xff]   ;;  %663 = vmatpush1.bf16.msra.mxu0 %v1255_v10  ;;  %v1258_v13 = vld [vmem:[#allocation7 + $0x10] ss:$8 sps:$4 sm:$0xff]   ;;  %v1261_v16 = vld [vmem:[#allocation7 + $0x20] ss:$8 sps:$4 sm:$0xff]  }
  0x60   :  { %664 = vmatprep.subr.bf16.mxu0 %v1256_v11  ;;  %v1259_v14 = vld [vmem:[#allocation7 + $0x24] ss:$8 sps:$4 sm:$0xff]   ;;  %v1250_v15 = vld [vmem:[#allocation5 + $0x28] ss:$16 sps:$4 sm:$0xff]   ;;  %v1262_v17 = vld [vmem:[#allocation7 + $0x34] ss:$8 sps:$4 sm:$0xff]  }
  0x61   :  { %179 = vmatpush1.bf16.msra.mxu1 %v1246_v4  ;;  %v1264_v18 = vld [vmem:[#allocation7 + $0x30] ss:$8 sps:$4 sm:$0xff]   ;;  %v1265_v19 = vld [vmem:[#allocation7 + $0x44] ss:$8 sps:$4 sm:$0xff]   ;;  %v1267_v20 = vld [vmem:[#allocation7 + $0x40] ss:$8 sps:$4 sm:$0xff]  }
  0x62   :  { %217 = vmatprep.subr.bf16.mxu1 %v1249_v6  ;;  %v1268_v21 = vld [vmem:[#allocation7 + $0x54] ss:$8 sps:$4 sm:$0xff]   ;;  %v1270_v22 = vld [vmem:[#allocation7 + $0x50] ss:$8 sps:$4 sm:$0xff]   ;;  %v1271_v23 = vld [vmem:[#allocation7 + $0x64] ss:$8 sps:$4 sm:$0xff]  }
  0x63   :  { %665 = vmatpush1.bf16.msra.mxu0 %v1258_v13  ;;  %v1273_v24 = vld [vmem:[#allocation7 + $0x60] ss:$8 sps:$4 sm:$0xff]   ;;  %v1274_v25 = vld [vmem:[#allocation7 + $0x74] ss:$8 sps:$4 sm:$0xff]   ;;  %v1276_v26 = vld [vmem:[#allocation7 + $0x70] ss:$8 sps:$4 sm:$0xff]  }
  0x64   :  { %1077 = vmatmul.mubr.msk.bf16.vlgmr.msra.gmra.mrb[0].mxu1 %vm172_vm0, %v101_v8  ;;  %666 = vmatprep.subr.bf16.mxu0 %v1259_v14  ;;  %v1277_v27 = vld [vmem:[#allocation7 + $0x84] ss:$8 sps:$4 sm:$0xff]   ;;  %v1279_v28 = vld [vmem:[#allocation7 + $0x80] ss:$8 sps:$4 sm:$0xff]   ;;  %v1280_v29 = vld [vmem:[#allocation7 + $0x94] ss:$8 sps:$4 sm:$0xff]  }
  0x65   :  { %218 = vmatpush1.bf16.msra.mxu1 %v1247_v7  ;;  %249 = vmatprep.mubr.bf16.mxu1 %v1528_v0  ;;  %v1282_v30 = vld [vmem:[#allocation7 + $0x90] ss:$8 sps:$4 sm:$0xff]   ;;  %v1283_v31 = vld [vmem:[#allocation7 + $0xa4] ss:$8 sps:$4 sm:$0xff]   ;;  %v1285_v32 = vld [vmem:[#allocation7 + $0xa0] ss:$8 sps:$4 sm:$0xff]  }
  0x66   :  { %219 = vmatprep.subr.bf16.mxu1 %v1252_v12  ;;  %v1286_v33 = vld [vmem:[#allocation7 + $0xb4] ss:$8 sps:$4 sm:$0xff]   ;;  %v1288_v34 = vld [vmem:[#allocation7 + $0xb0] ss:$8 sps:$4 sm:$0xff]   ;;  %v1289_v35 = vld [vmem:[#allocation7 + $0xc4] ss:$8 sps:$4 sm:$0xff]  }
  0x67   :  { %667 = vmatpush1.bf16.msra.mxu0 %v1261_v16  ;;  %v1291_v36 = vld [vmem:[#allocation7 + $0xc0] ss:$8 sps:$4 sm:$0xff]   ;;  %v1292_v37 = vld [vmem:[#allocation7 + $0xd4] ss:$8 sps:$4 sm:$0xff]   ;;  %v1294_v38 = vld [vmem:[#allocation7 + $0xd0] ss:$8 sps:$4 sm:$0xff]  }
  0x68   :  { %668 = vmatprep.subr.bf16.mxu0 %v1262_v17  ;;  %v1295_v39 = vld [vmem:[#allocation7 + $0xe4] ss:$8 sps:$4 sm:$0xff]   ;;  %v1297_v40 = vld [vmem:[#allocation7 + $0xe0] ss:$8 sps:$4 sm:$0xff]   ;;  %v1298_v41 = vld [vmem:[#allocation7 + $0xf4] ss:$8 sps:$4 sm:$0xff]  }
  0x69   :  { %220 = vmatpush1.bf16.msra.mxu1 %v1250_v15  ;;  %v1300_v42 = vld [vmem:[#allocation7 + $0xf0] ss:$8 sps:$4 sm:$0xff]   ;;  %v1303_v43 = vld [vmem:[#allocation7 + $0x104] ss:$8 sps:$4 sm:$0xff]   ;;  %v114_v58 = vsub.s32 0, %v1657_v57  ;;  %v118_v60 = vsub.s32 1, %v1657_v57 }
  0x6a   :  { %v1349_v44 = vld [vmem:[#allocation8 + $0x40] sm:$0xff]   ;;  %v1351_v46 = vld [vmem:[#allocation8 + $0x48] sm:$0xff]   ;;  %v1353_v48 = vld [vmem:[#allocation8 + $0x50] sm:$0xff]   ;;  %v126_v4 = vsub.s32 3, %v1657_v57  ;;  %vm1530_vm1 = vmmov 0   ;;  %vm1037_vm2 = vcmask 64512  }
  0x6b   :  { %669 = vmatpush1.bf16.msra.mxu0 %v1264_v18  ;;  %v1350_v45 = vld [vmem:[#allocation8] sm:$0xff]   ;;  %1169 = vmatprep.subr.bf16.mxu1 %v1349_v44  ;;  %v1352_v47 = vld [vmem:[#allocation8 + $0x8] sm:$0xff]   ;;  %v1354_v49 = vld [vmem:[#allocation8 + $0x10] sm:$0xff]  }
  0x6c   :  { %1078 = vmatmul.mubr.msk.bf16.vlgmr.msra.gmra.mrb[4].mxu1 %vm172_vm0, %v101_v8  ;;  %670 = vmatprep.subr.bf16.mxu0 %v1265_v19  ;;  %v1355_v50 = vld [vmem:[#allocation8 + $0x58] sm:$0xff]   ;;  %v1357_v52 = vld [vmem:[#allocation8 + $0x60] sm:$0xff]   ;;  %v1359_v54 = vld [vmem:[#allocation8 + $0x68] sm:$0xff]  }
  0x6d   :  { %1170 = vmatpush3.bf16.msra.mxu1 %v1350_v45  ;;  %v1356_v51 = vld [vmem:[#allocation8 + $0x18] sm:$0xff]   ;;  %v1358_v53 = vld [vmem:[#allocation8 + $0x20] sm:$0xff]   ;;  %v1360_v55 = vld [vmem:[#allocation8 + $0x28] sm:$0xff]  }
  0x6e   :  { %1171 = vmatprep.subr.bf16.mxu1 %v1351_v46  ;;  %v1663_v59 = vld [vmem:[%s1708_s2] sm:$0xf]  ;;  %v1301_v9 = vld [vmem:[#allocation7 + $0x100] ss:$8 sps:$4 sm:$0xff]   ;;  %v1306_v12 = vld [vmem:[#allocation7 + $0x114] ss:$8 sps:$4 sm:$0xff]  }
  0x6f   :  { %671 = vmatpush1.bf16.msra.mxu0 %v1267_v20  ;;  %v115_v61 = vrot.slane %v1663_v59, %v114_v58  ;;  %v119_v62 = vrot.slane %v1663_v59, %v118_v60  ;;  %v127_v10 = vrot.slane %v1663_v59, %v126_v4  ;;  %v1304_v15 = vld [vmem:[#allocation7 + $0x110] ss:$8 sps:$4 sm:$0xff]   ;;  %v1309_v18 = vld [vmem:[#allocation7 + $0x124] ss:$8 sps:$4 sm:$0xff]   ;;  %v1342_v44 = vld [vmem:[#allocation7 + $0x1d4] ss:$8 sps:$4 sm:$0xff]  }
  0x70   :  { %672 = vmatprep.subr.bf16.mxu0 %v1268_v21  ;;  %v1307_v21 = vld [vmem:[#allocation7 + $0x120] ss:$8 sps:$4 sm:$0xff]   ;;  %v1340_v45 = vld [vmem:[#allocation7 + $0x1d0] ss:$8 sps:$4 sm:$0xff]  }
  0x71   :  { %1172 = vmatpush3.bf16.msra.mxu1 %v1352_v47  ;;  %v1345_v47 = vld [vmem:[#allocation7 + $0x1e4] ss:$8 sps:$4 sm:$0xff]   ;;  %v1363_v56 = vld [vmem:[#allocation8 + $0x78] sm:$0xff]  }
  0x72   :  { %1173 = vmatprep.subr.bf16.mxu1 %v1353_v48  ;;  %v1343_v48 = vld [vmem:[#allocation7 + $0x1e0] ss:$8 sps:$4 sm:$0xff]  }
  0x73   :  { %673 = vmatpush1.bf16.msra.mxu0 %v1270_v22 }
  0x74   :  { %674 = vmatprep.subr.bf16.mxu0 %v1271_v23  ;;  %v1312_v23 = vld [vmem:[#allocation7 + $0x134] ss:$8 sps:$4 sm:$0xff]  }
  0x75   :  { %1174 = vmatpush3.bf16.msra.mxu1 %v1354_v49 }
  0x76   :  { %1175 = vmatprep.subr.bf16.mxu1 %v1355_v50  ;;  %v1348_v50 = vld [vmem:[#allocation7 + $0x1f4] ss:$8 sps:$4 sm:$0xff]  }
  0x77   :  { %675 = vmatpush1.bf16.msra.mxu0 %v1273_v24  ;;  %v1310_v24 = vld [vmem:[#allocation7 + $0x130] ss:$8 sps:$4 sm:$0xff]  }
  0x78   :  { %676 = vmatprep.subr.bf16.mxu0 %v1274_v25  ;;  %v1315_v25 = vld [vmem:[#allocation7 + $0x144] ss:$8 sps:$4 sm:$0xff]  }
  0x79   :  { %1176 = vmatpush3.bf16.msra.mxu1 %v1356_v51  ;;  %v1346_v51 = vld [vmem:[#allocation7 + $0x1f0] ss:$8 sps:$4 sm:$0xff]  }
  0x7a   :  { %1177 = vmatprep.subr.bf16.mxu1 %v1357_v52 }
  0x7b   :  { %677 = vmatpush1.bf16.msra.mxu0 %v1276_v26  ;;  %v1313_v26 = vld [vmem:[#allocation7 + $0x140] ss:$8 sps:$4 sm:$0xff]  }
  0x7c   :  { %678 = vmatprep.subr.bf16.mxu0 %v1277_v27  ;;  %v1318_v27 = vld [vmem:[#allocation7 + $0x154] ss:$8 sps:$4 sm:$0xff]  }
  0x7d   :  { %1178 = vmatpush3.bf16.msra.mxu1 %v1358_v53 }
  0x7e   :  { %1179 = vmatprep.subr.bf16.mxu1 %v1359_v54  ;;  %v1361_v54 = vld [vmem:[#allocation8 + $0x70] sm:$0xff]  }
  0x7f   :  { %679 = vmatpush1.bf16.msra.mxu0 %v1279_v28  ;;  %v1316_v28 = vld [vmem:[#allocation7 + $0x150] ss:$8 sps:$4 sm:$0xff]  }
  0x80   :  { %680 = vmatprep.subr.bf16.mxu0 %v1280_v29  ;;  %v1321_v29 = vld [vmem:[#allocation7 + $0x164] ss:$8 sps:$4 sm:$0xff]  }
  0x81   :  { %1180 = vmatpush3.bf16.msra.mxu1 %v1360_v55  ;;  %v1362_v55 = vld [vmem:[#allocation8 + $0x30] sm:$0xff]  }
  0x82   :  { %1181 = vmatprep.subr.bf16.mxu1 %v1361_v54 }
  0x83   :  { %681 = vmatpush1.bf16.msra.mxu0 %v1282_v30  ;;  %v1319_v30 = vld [vmem:[#allocation7 + $0x160] ss:$8 sps:$4 sm:$0xff]  }
  0x84   :  { %682 = vmatprep.subr.bf16.mxu0 %v1283_v31  ;;  %v1324_v31 = vld [vmem:[#allocation7 + $0x174] ss:$8 sps:$4 sm:$0xff]  }
  0x85   :  { %1182 = vmatpush3.bf16.msra.mxu1 %v1362_v55 }
  0x86   :  { %1183 = vmatprep.subr.bf16.mxu1 %v1363_v56 }
  0x87   :  { %683 = vmatpush1.bf16.msra.mxu0 %v1285_v32  ;;  %v1322_v32 = vld [vmem:[#allocation7 + $0x170] ss:$8 sps:$4 sm:$0xff]  }
  0x88   :  { %684 = vmatprep.subr.bf16.mxu0 %v1286_v33  ;;  %v1327_v33 = vld [vmem:[#allocation7 + $0x184] ss:$8 sps:$4 sm:$0xff]  }
  0x8b   :  { %685 = vmatpush1.bf16.msra.mxu0 %v1288_v34  ;;  %v1325_v34 = vld [vmem:[#allocation7 + $0x180] ss:$8 sps:$4 sm:$0xff]  }
  0x8c   :  { %686 = vmatprep.subr.bf16.mxu0 %v1289_v35  ;;  %v1330_v35 = vld [vmem:[#allocation7 + $0x194] ss:$8 sps:$4 sm:$0xff]  }
  0x8f   :  { %687 = vmatpush1.bf16.msra.mxu0 %v1291_v36  ;;  %v1328_v36 = vld [vmem:[#allocation7 + $0x190] ss:$8 sps:$4 sm:$0xff]  }
  0x90   :  { %688 = vmatprep.subr.bf16.mxu0 %v1292_v37  ;;  %v1333_v37 = vld [vmem:[#allocation7 + $0x1a4] ss:$8 sps:$4 sm:$0xff]  }
  0x93   :  { %689 = vmatpush1.bf16.msra.mxu0 %v1294_v38  ;;  %v1331_v38 = vld [vmem:[#allocation7 + $0x1a0] ss:$8 sps:$4 sm:$0xff]  }
  0x94   :  { %690 = vmatprep.subr.bf16.mxu0 %v1295_v39  ;;  %v1336_v39 = vld [vmem:[#allocation7 + $0x1b4] ss:$8 sps:$4 sm:$0xff]  }
  0x97   :  { %691 = vmatpush1.bf16.msra.mxu0 %v1297_v40  ;;  %v1334_v40 = vld [vmem:[#allocation7 + $0x1b0] ss:$8 sps:$4 sm:$0xff]  }
  0x98   :  { %692 = vmatprep.subr.bf16.mxu0 %v1298_v41  ;;  %v1339_v41 = vld [vmem:[#allocation7 + $0x1c4] ss:$8 sps:$4 sm:$0xff]  }
  0x9b   :  { %693 = vmatpush1.bf16.msra.mxu0 %v1300_v42  ;;  %v1337_v42 = vld [vmem:[#allocation7 + $0x1c0] ss:$8 sps:$4 sm:$0xff]  }
  0x9c   :  { %703 = vmatprep.subr.bf16.mxu0 %v1303_v43  ;;  %v122_v43 = vsub.s32 2, %v1657_v57  ;;  %v1368_v57 = vld [vmem:[#allocation10 + $0x18] sm:$0xff]  }
  0x9e   :  { %v123_v46 = vrot.slane %v1663_v59, %v122_v43  ;;  %v1364_v59 = vld [vmem:[#allocation8 + $0x38] sm:$0xff]  }
  0x9f   :  { %1184 = vmatpush3.bf16.msra.mxu1 %v1364_v59 }
 0x137   :  { %v210_v63 = vpop.f32.mrb[0].mxu1 }
 0x138   :  { %v211_v0 = vadd.f32 %v210_v63, %v115_v61  ;;  %v212_v1 = vpop.f32.mrb[1].mxu1  ;;  %v1529_v61 = vmov 0.0  }
 0x139   :  { %v213_v2 = vadd.f32 %v212_v1, %v119_v62  ;;  %v214_v3 = vpop.f32.mrb[2].mxu1  ;;  %1200 = vmatprep.subr.bf16.mxu1 %v1529_v61  ;;  %v330_v62 = vld [vmem:[%s1710_s4] sm:$0x3] }
 0x13a   :  { %v258_v5 = vmax.f32 %v211_v0, 0.0  ;;  %v215_v6 = vpop.f32.mrb[3].mxu1  ;;  %v335_v63 = vrot.slane %v330_v62, %v114_v58  ;;  %v339_v0 = vrot.slane %v330_v62, %v118_v60  ;;  %v1367_v58 = vld [vmem:[#allocation10 + $0x10] sm:$0xff]   ;;  %v1369_v60 = vld [vmem:[#allocation10 + $0x20] sm:$0xff]  }
 0x13b   :  { %v259_v7 = vmax.f32 %v213_v2, 0.0 }
 0x13c   :  { %v262_v11 = vpack.c.bf16 %v258_v5, %v258_v5 }
 0x13d   :  { %v263_v8 = vpack.c.bf16 %v259_v7, %v259_v7 }
 0x13f   :  { %694 = vmatprep.mubr.bf16.mxu0 %v263_v8  ;;  %v1674_v13 = vpop.f32.mrb[4].mxu1 }
 0x140   :  { %695 = vmatmul.mubr.bf16.vlgmr.msra.gmra.mrb[0].mxu0 %v262_v11  ;;  %v253_v14 = vpop.f32.mrb[5].mxu1  ;;  %v252_v49 = vadd.f32 %v1674_v13, %v123_v46  ;;  %v1370_v13 = vld [vmem:[#allocation10 + $0x28] sm:$0xff]  }
 0x141   :  { %704 = vmatpush1.bf16.msra.mxu0 %v1301_v9  ;;  %v254_v16 = vadd.f32 %v253_v14, %v127_v10  ;;  %v255_v17 = vpop.f32.mrb[6].mxu1  ;;  %v1365_v10 = vld [vmem:[#allocation10] sm:$0xff]   ;;  %v1371_v14 = vld [vmem:[#allocation10 + $0x30] sm:$0xff]  }
 0x142   :  { %705 = vmatprep.subr.bf16.mxu0 %v1306_v12  ;;  %v256_v19 = vpop.f32.mrb[7].mxu1  ;;  %v260_v52 = vmax.f32 %v252_v49, 0.0  ;;  %v1366_v12 = vld [vmem:[#allocation10 + $0x8] sm:$0xff]   ;;  %v1143_v17 = vld [vmem:[%s1712_s6] ss:$0 sm:$0xff]  ;;  %s1531_s6 = smov [#allocation11]  }
 0x143   :  { %v261_v20 = vmax.f32 %v254_v16, 0.0 }
 0x144   :  { %v264_v53 = vpack.c.bf16 %v260_v52, %v260_v52 }
 0x145   :  { %706 = vmatpush1.bf16.msra.mxu0 %v1304_v15  ;;  %v265_v22 = vpack.c.bf16 %v261_v20, %v261_v20  ;;  %v1372_v15 = vld [vmem:[#allocation10 + $0x38] sm:$0xff]  }
 0x146   :  { %707 = vmatprep.subr.bf16.mxu0 %v1309_v18 }
 0x147   :  { %735 = vmatprep.mubr.bf16.mxu0 %v265_v22 }
 0x149   :  { %708 = vmatpush1.bf16.msra.mxu0 %v1307_v21 }
 0x14a   :  { %709 = vmatprep.subr.bf16.mxu0 %v1312_v23 }
 0x14d   :  { %710 = vmatpush1.bf16.msra.mxu0 %v1310_v24 }
 0x14e   :  { %711 = vmatprep.subr.bf16.mxu0 %v1315_v25  ;;  %v1160_v25 = vld [vmem:[%s1714_s8] ss:$0 sm:$0xff]  ;;  %s1058_s8 = sshll.u32 %s1531_s6, 4  ;;  %s1059_s8 = int_to_ptr.vmem [resolvable:$true] %s1058_s8 }
 0x14f   :  { %s1487_s12 = scalar_lea.vmem %s1059_s8, 128  ;;  %p1492_p13 = scmp.lt.s32.totalorder %s1059_s8, %s1059_s8 }
 0x150   :  { %p1488_p12 = scmp.ne.s32.totalorder %s1059_s8, %s1487_s12  ;;  %p1493_p0 = scmp.lt.s32.totalorder %s1487_s12, %s1487_s12 }
 0x151   :  { %712 = vmatpush1.bf16.msra.mxu0 %v1313_v26 }
 0x152   :  { %713 = vmatprep.subr.bf16.mxu0 %v1318_v27  ;;  %p1494_p1 = por %p1493_p0, %p1492_p13 }
 0x154   :  { %p1495_p2 = pnand %p1494_p1, %p1488_p12 }
 0x155   :  { %714 = vmatpush1.bf16.msra.mxu0 %v1316_v28 }
 0x156   :  { %715 = vmatprep.subr.bf16.mxu0 %v1321_v29 }
 0x159   :  { %716 = vmatpush1.bf16.msra.mxu0 %v1319_v30 }
 0x15a   :  { %717 = vmatprep.subr.bf16.mxu0 %v1324_v31 }
 0x15d   :  { %718 = vmatpush1.bf16.msra.mxu0 %v1322_v32 }
 0x15e   :  { %719 = vmatprep.subr.bf16.mxu0 %v1327_v33 }
 0x161   :  { %720 = vmatpush1.bf16.msra.mxu0 %v1325_v34 }
 0x162   :  { %721 = vmatprep.subr.bf16.mxu0 %v1330_v35 }
 0x165   :  { %722 = vmatpush1.bf16.msra.mxu0 %v1328_v36 }
 0x166   :  { %723 = vmatprep.subr.bf16.mxu0 %v1333_v37 }
 0x169   :  { %724 = vmatpush1.bf16.msra.mxu0 %v1331_v38 }
 0x16a   :  { %725 = vmatprep.subr.bf16.mxu0 %v1336_v39 }
 0x16d   :  { %726 = vmatpush1.bf16.msra.mxu0 %v1334_v40 }
 0x16e   :  { %727 = vmatprep.subr.bf16.mxu0 %v1339_v41 }
 0x171   :  { %728 = vmatpush1.bf16.msra.mxu0 %v1337_v42 }
 0x172   :  { %729 = vmatprep.subr.bf16.mxu0 %v1342_v44 }
 0x175   :  { %730 = vmatpush1.bf16.msra.mxu0 %v1340_v45 }
 0x176   :  { %731 = vmatprep.subr.bf16.mxu0 %v1345_v47 }
 0x179   :  { %732 = vmatpush1.bf16.msra.mxu0 %v1343_v48 }
 0x17a   :  { %733 = vmatprep.subr.bf16.mxu0 %v1348_v50 }
 0x17d   :  { %734 = vmatpush1.bf16.msra.mxu0 %v1346_v51 }
 0x180   :  { %736 = vmatmul.mubr.bf16.vlgmr.msra.gmra.mrb[0].mxu0 %v264_v53 }
 0x253   :  { %v737_v1 = vpop.f32.mrb[0].mxu0 }
 0x254   :  { %v1220_v2 = vadd.f32 %v737_v1, %v335_v63  ;;  %v739_v3 = vpop.f32.mrb[1].mxu0 }
 0x255   :  { %v1221_v4 = vadd.f32 %v739_v3, %v339_v0  ;;  %v741_v5 = vpop.f32.mrb[2].mxu0 }
 0x256   :  { %v744_v6 = vmax.f32 %v1220_v2, 0.0  ;;  %v742_v7 = vpop.f32.mrb[3].mxu0 }
 0x257   :  { %v745_v8 = vmax.f32 %v1221_v4, 0.0 }
 0x258   :  { %v746_v11 = vpack.c.bf16 %v744_v6, %v744_v6 }
 0x259   :  { %v747_v9 = vpack.c.bf16 %v745_v8, %v745_v8 }
 0x25b   :  { %915 = vmatprep.mubr.bf16.mxu1 %v747_v9 }
 0x25c   :  { %916 = vmatmul.mubr.bf16.vlgmr.msra.gmra.mrb[8].mxu1 %v746_v11 }
 0x25d   :  { %1201 = vmatpush3.bf16.msra.mxu1 %v1365_v10  ;;  %1216 = vmatprep.mubr.msk.bf16.mxu1 %vm1530_vm1, %v1529_v61 }
 0x25e   :  { %1202 = vmatprep.subr.bf16.mxu1 %v1529_v61 }
 0x261   :  { %1203 = vmatpush3.bf16.msra.mxu1 %v1366_v12 }
 0x262   :  { %1204 = vmatprep.subr.bf16.mxu1 %v1529_v61 }
 0x265   :  { %1205 = vmatpush3.bf16.msra.mxu1 %v1367_v58 }
 0x266   :  { %1206 = vmatprep.subr.bf16.mxu1 %v1529_v61 }
 0x269   :  { %1207 = vmatpush3.bf16.msra.mxu1 %v1368_v57 }
 0x26a   :  { %1208 = vmatprep.subr.bf16.mxu1 %v1529_v61 }
 0x26d   :  { %1209 = vmatpush3.bf16.msra.mxu1 %v1369_v60 }
 0x26e   :  { %1210 = vmatprep.subr.bf16.mxu1 %v1529_v61 }
 0x271   :  { %1211 = vmatpush3.bf16.msra.mxu1 %v1370_v13 }
 0x272   :  { %1212 = vmatprep.subr.bf16.mxu1 %v1529_v61 }
 0x275   :  { %1213 = vmatpush3.bf16.msra.mxu1 %v1371_v14 }
 0x276   :  { %1214 = vmatprep.subr.bf16.mxu1 %v1529_v61 }
 0x279   :  { %1215 = vmatpush3.bf16.msra.mxu1 %v1372_v15 }
 0x32f   :  { %v1185_v16 = vpop.f32.mrb[8].mxu1 }
 0x330   :  { %v1186_v18 = vpop.f32.mrb[9].mxu1 }
 0x331   :  { %v1187_v19 = vadd.f32 %v1186_v18, %v1185_v16  ;;  %v1188_v20 = vpop.f32.mrb[10].mxu1 }
 0x332   :  { %v1189_v21 = vpop.f32.mrb[11].mxu1 }
 0x333   :  { %v918_v22 = vadd.f32 %v1187_v19, %v1143_v17 }
 0x335   :  { %v923_v23 = vmax.f32 %v918_v22, 0.0 }
 0x337   :  { %v924_v24 = vpack.c.bf16 %v923_v23, %v923_v23 }
 0x339   :  { %1217 = vmatmul.mubr.bf16.vlgmr.msra.gmra.mrb[12].mxu1 %v924_v24 }
 0x40c   :  { %v1030_v26 = vpop.f32.mrb[12].mxu1 }
 0x40d   :  { %v1031_v27 = vadd.f32 %v1160_v25, %v1030_v26  ;;  %v1218_v28 = vpop.f32.mrb[13].mxu1 }
 0x40e   :  { %v1033_v29 = vpop.f32.mrb[14].mxu1 }
 0x40f   :  { %v1219_v30 = vpop.f32.mrb[15].mxu1  ;;  %v1036_v31 = vmul.f32 %v1031_v27, %v1031_v27 }
 0x411   :  { %v1038_v32 = vsel %vm1037_vm2, %v1036_v31, 0.0 }
 0x412   :  { %1039 = vadd.xlane.f32.xlu0 %v1038_v32 }
 0x49f   :  { %v1040_v33 = vpop.xlane.xlu0 %1039 }
 0x4a0   :  { %1373 = vrsqrt.f32 %v1040_v33  ;;  %vm1043_vm3 = vcmp.eq.f32.partialorder %v1040_v33, inf  ;;  %v1046_v36 = vand.u32 2147483648, %v1040_v33  ;;  %vm1045_vm4 = vcmp.eq.f32.partialorder %v1040_v33, 0.0 }
 0x4aa   :  { %v1374_v34 = vpop.eup %1373 }
 0x4ab   :  { %v1042_v35 = vmul.f32 %v1374_v34, %v1040_v33 }
 0x4ad   :  { %v1044_v37 = vsel %vm1043_vm3, %v1040_v33, %v1042_v35 }
 0x4ae   :  { %v1047_v38 = vsel %vm1045_vm4, %v1046_v36, %v1044_v37 }
 0x4af   :  { %v1048_v39 = vadd.f32 1e-06, %v1047_v38 }
 0x4b1   :  { %1375 = vrcp.f32 %v1048_v39 }
 0x4bb   :  { %v1376_v40 = vpop.eup %1375 }
 0x4bc   :  { %v1050_v41 = vmul.f32 %v1376_v40, %v1031_v27 }
 0x4be   :  { %1051 = vst.msk [vmem:[#allocation11] sm:$0xff] %vm1037_vm2, %v1050_v41 }
 0x4bf   :  { %1498 = shalt.err (!%p1495_p2)
}
 0x4c0   :  { %s1499_s15 = scalar_lea.hbm %s1715_s9, 128 }
 0x4c1   :  { %p1500_p3 = scmp.ne.s32.totalorder %s1715_s9, %s1499_s15  ;;  %p1503_p4 = scmp.lt.u32.totalorder %s1499_s15, %s1715_s9 }
 0x4c3   :  { %p1505_p5 = pnand %p1503_p4, %p1500_p3 }
 0x4c5   :  { %1508 = shalt.err (!%p1505_p5)
}
 0x4c6   :  { %1061 = dma.vmem_to_hbm [thread:$0]  %s1059_s8, 128, %s1715_s9, [#allocation4]  }
 0x4c7   :  { %1515 = dma.done.wait [#allocation4], 128  }
 0x4c8   :  { %1516 = vsyncadd [#allocation4], 4294967168 }
 0x4c9   :  { %1065 = vsyncpa [#allocation3], 1 }
 0x4ca   :  { %1066 = vsyncpa [#allocation6], 1 }
 0x4cb   :  { %1067 = vsyncpa [#allocation9], 1 }
 0x4cc   :  { %1068 = vsyncpa [#allocation4], 1 }

</bundles_post_ra>
